<compile_context>
chip_gen: v7x
topology: tpu7x:2x2x1
jax: 0.10.0
libtpu: 0.0.40
codegen_flags: <defaults>
</compile_context>

<pallas_src>
import functools

import jax
import jax.numpy as jnp
from jax.experimental import pallas as pl
from jax.experimental.pallas import tpu as pltpu


OUT_PAD = 128          # lane-dense padded output width (true out_size = 1)
LN_EPS = 1e-5          # PyTorch nn.LayerNorm default
NEG_SLOPE = 0.1        # nn.LeakyReLU(0.1)


# ---------------------------------------------------------------------------
# Fused Pallas kernel: Linear1 -> LeakyReLU(0.1) -> LayerNorm -> Linear2
# ---------------------------------------------------------------------------
def _critic_kernel(x_ref, w1_ref, b1_ref, g_ref, bt_ref, w2_ref, b2_ref, o_ref):
    x = x_ref[...]                                            # (tB, F) f32
    # Linear1 (MXU, f32 accumulate).  NOTE: on v6e/v7x the operands could be
    # cast to bf16 to halve DMA bytes; kept f32 here for exact parity with
    # the PyTorch reference.
    y = jnp.dot(x, w1_ref[...], preferred_element_type=jnp.float32)
    y = y + b1_ref[...]                                       # (tB, H)
    # LeakyReLU(0.1)
    a = jnp.where(y >= 0, y, NEG_SLOPE * y)
    # LayerNorm over the hidden axis (biased variance, like PyTorch)
    mu = jnp.mean(a, axis=-1, keepdims=True)
    d = a - mu
    var = jnp.mean(d * d, axis=-1, keepdims=True)
    n = d * jax.lax.rsqrt(var + LN_EPS)
    n = n * g_ref[...] + bt_ref[...]
    # Linear2 into the lane-padded output (only column 0 is real)
    out = jnp.dot(n, w2_ref[...], preferred_element_type=jnp.float32)
    out = out + b2_ref[...]
    o_ref[...] = out.astype(o_ref.dtype)


# ---------------------------------------------------------------------------
# Parameter packing (done once, outside the per-call path)
# ---------------------------------------------------------------------------
def prepare_critic_params(w1, b1, gamma, beta, w2, b2):
    """w1: (F, H); b1/gamma/beta: (H,); w2: (H, 1); b2: (1,)."""
    H = w1.shape[1]
    out = w2.shape[1]
    w2p = jnp.zeros((H, OUT_PAD), w2.dtype).at[:, :out].set(w2)
    b2p = jnp.zeros((OUT_PAD,), b2.dtype).at[:out].set(b2)
    return dict(
        w1=w1,
        b1=b1.reshape(1, H),
        gamma=gamma.reshape(1, H),
        beta=beta.reshape(1, H),
        w2p=w2p,
        b2p=b2p.reshape(1, OUT_PAD),
    )


def _batch_tile(B):
    # Biggest batch tile that keeps VMEM modest and blocks (8,128)-legal.
    if B <= 8:
        return B                        # single full-extent block (exempt)
    for t in (1024, 512, 256, 128, 64, 32, 16, 8):
        if t <= B:
            return t
    return 8


# ---------------------------------------------------------------------------
# Forward wrapper
# ---------------------------------------------------------------------------
@jax.jit
def critic_layer_forward(x, params):
    """x: (B, F) f32 -> (B, 1) f32 (CriticLayer forward)."""
    B, F = x.shape
    H = params["w1"].shape[1]

    tile = _batch_tile(B)
    Bp = pl.cdiv(B, tile) * tile
    xp = x if Bp == B else jnp.pad(x, ((0, Bp - B), (0, 0)))

    out = pl.pallas_call(
        _critic_kernel,
        out_shape=jax.ShapeDtypeStruct((Bp, OUT_PAD), x.dtype),
        grid_spec=pl.GridSpec(
            grid=(Bp // tile,),
            in_specs=[
                pl.BlockSpec((tile, F), lambda i: (i, 0)),        # x tile
                pl.BlockSpec((F, H), lambda i: (0, 0)),           # W1 resident
                pl.BlockSpec((1, H), lambda i: (0, 0)),           # b1
                pl.BlockSpec((1, H), lambda i: (0, 0)),           # gamma
                pl.BlockSpec((1, H), lambda i: (0, 0)),           # beta
                pl.BlockSpec((H, OUT_PAD), lambda i: (0, 0)),     # W2 (padded)
                pl.BlockSpec((1, OUT_PAD), lambda i: (0, 0)),     # b2 (padded)
            ],
            out_specs=pl.BlockSpec((tile, OUT_PAD), lambda i: (i, 0)),
        ),
        compiler_params=pltpu.CompilerParams(
            dimension_semantics=("parallel",),
        ),
    )(xp, params["w1"], params["b1"], params["gamma"], params["beta"],
      params["w2p"], params["b2p"])

    return out[:B, :1]


# ---------------------------------------------------------------------------
# Reference (plain JAX) and deterministic init mimicking nn.Linear
# ---------------------------------------------------------------------------
def _init_linear(key, fan_in, fan_out):
    kw, kb = jax.random.split(key)
    bound = 1.0 / jnp.sqrt(jnp.float32(fan_in))
    w = jax.random.uniform(kw, (fan_in, fan_out), jnp.float32, -bound, bound)
    b = jax.random.uniform(kb, (fan_out,), jnp.float32, -bound, bound)
    return w, b


def critic_layer_ref(x, w1, b1, gamma, beta, w2, b2):
    y = x @ w1 + b1
    a = jnp.where(y >= 0, y, NEG_SLOPE * y)
    mu = jnp.mean(a, axis=-1, keepdims=True)
    var = jnp.mean((a - mu) ** 2, axis=-1, keepdims=True)
    n = (a - mu) / jnp.sqrt(var + LN_EPS) * gamma + beta
    return n @ w2 + b2


if __name__ == "__main__":
    key = jax.random.PRNGKey(0)
    features = 32
    hidden = features // 2            # 16
    out_size = 1

    k_x, k_x2, k_l1, k_l2 = jax.random.split(key, 4)

    # Parameters (LayerNorm inits: gamma=1, beta=0, like PyTorch)
    w1, b1 = _init_linear(k_l1, features, hidden)
    w2, b2 = _init_linear(k_l2, hidden, out_size)
    gamma = jnp.ones((hidden,), jnp.float32)
    beta = jnp.zeros((hidden,), jnp.float32)
    params = prepare_critic_params(w1, b1, gamma, beta, w2, b2)

    # --- small batch (single full-extent block) ---
    batch = 2
    x = jax.random.normal(k_x, (batch, features), jnp.float32)
    out = jax.block_until_ready(critic_layer_forward(x, params))
    ref = critic_layer_ref(x, w1, b1, gamma, beta, w2, b2)
    assert out.shape == (batch, 1)
    assert jnp.allclose(out, ref, atol=1e-5, rtol=1e-5)

    # --- larger batch exercising the tiled "parallel" grid + batch padding ---
    batch2 = 300
    x2 = jax.random.normal(k_x2, (batch2, features), jnp.float32)
    out2 = jax.block_until_ready(critic_layer_forward(x2, params))
    ref2 = critic_layer_ref(x2, w1, b1, gamma, beta, w2, b2)
    assert out2.shape == (batch2, 1)
    assert jnp.allclose(out2, ref2, atol=1e-5, rtol=1e-5)

    print("KERNEL_OK")
</pallas_src>

<mosaic_0001>
module attributes {stable_mosaic.version = 11 : i64} {
  func.func @_critic_kernel(%arg0: i32, %arg1: memref<2x32xf32, #tpu.memory_space<vmem>>, %arg2: memref<32x16xf32, #tpu.memory_space<vmem>>, %arg3: memref<1x16xf32, #tpu.memory_space<vmem>>, %arg4: memref<1x16xf32, #tpu.memory_space<vmem>>, %arg5: memref<1x16xf32, #tpu.memory_space<vmem>>, %arg6: memref<16x128xf32, #tpu.memory_space<vmem>>, %arg7: memref<1x128xf32, #tpu.memory_space<vmem>>, %arg8: memref<2x128xf32, #tpu.memory_space<vmem>>) attributes {dimension_semantics = [#tpu.dimension_semantics<parallel>], iteration_bounds = array<i64: 1>, scalar_prefetch = 0 : i64, scratch_operands = 0 : i64, tpu.core_type = #tpu.core_type<tc>, window_params = [{transform_indices = @transform_0, window_bounds = array<i64: 2, 32>}, {pipeline_mode = #tpu.pipeline_mode<synchronous>, transform_indices = @transform_1, window_bounds = array<i64: 32, 16>}, {pipeline_mode = #tpu.pipeline_mode<synchronous>, transform_indices = @transform_2, window_bounds = array<i64: 1, 16>}, {pipeline_mode = #tpu.pipeline_mode<synchronous>, transform_indices = @transform_3, window_bounds = array<i64: 1, 16>}, {pipeline_mode = #tpu.pipeline_mode<synchronous>, transform_indices = @transform_4, window_bounds = array<i64: 1, 16>}, {pipeline_mode = #tpu.pipeline_mode<synchronous>, transform_indices = @transform_5, window_bounds = array<i64: 16, 128>}, {pipeline_mode = #tpu.pipeline_mode<synchronous>, transform_indices = @transform_6, window_bounds = array<i64: 1, 128>}, {transform_indices = @transform_7, window_bounds = array<i64: 2, 128>}]} {
    %c0 = arith.constant 0 : index
    %c0_0 = arith.constant 0 : index
    %0 = vector.load %arg1[%c0, %c0_0] : memref<2x32xf32, #tpu.memory_space<vmem>>, vector<2x32xf32>
    %c0_1 = arith.constant 0 : index
    %c0_2 = arith.constant 0 : index
    %1 = vector.load %arg2[%c0_1, %c0_2] : memref<32x16xf32, #tpu.memory_space<vmem>>, vector<32x16xf32>
    %cst = arith.constant dense<0.000000e+00> : vector<2x16xf32>
    %2 = tpu.matmul %0, %1, %cst {dimension_numbers = #tpu.dot_dimension_numbers<[1], [0], [0], [1], [0, 0, 1, 1], [], []>} : vector<2x32xf32>, vector<32x16xf32>, vector<2x16xf32> -> vector<2x16xf32>
    %c0_3 = arith.constant 0 : index
    %c0_4 = arith.constant 0 : index
    %3 = vector.load %arg3[%c0_3, %c0_4] : memref<1x16xf32, #tpu.memory_space<vmem>>, vector<1x16xf32>
    %4 = vector.broadcast %3 : vector<1x16xf32> to vector<2x16xf32>
    %5 = arith.addf %2, %4 : vector<2x16xf32>
    %cst_5 = arith.constant 0.000000e+00 : f32
    %6 = vector.broadcast %cst_5 : f32 to vector<2x16xf32>
    %7 = arith.cmpf oge, %5, %6 : vector<2x16xf32>
    %cst_6 = arith.constant 1.000000e-01 : f32
    %8 = vector.broadcast %cst_6 : f32 to vector<2x16xf32>
    %9 = arith.mulf %8, %5 : vector<2x16xf32>
    %10 = arith.select %7, %5, %9 : vector<2x16xi1>, vector<2x16xf32>
    %cst_7 = arith.constant dense<0.000000e+00> : vector<2xf32>
    %11 = vector.multi_reduction <add>, %10, %cst_7 [1] : vector<2x16xf32> to vector<2xf32>
    %12 = vector.shape_cast %11 : vector<2xf32> to vector<2x1xf32>
    %cst_8 = arith.constant 1.600000e+01 : f32
    %13 = vector.broadcast %cst_8 : f32 to vector<2x1xf32>
    %14 = arith.divf %12, %13 : vector<2x1xf32>
    %15 = vector.broadcast %14 : vector<2x1xf32> to vector<2x16xf32>
    %16 = arith.subf %10, %15 : vector<2x16xf32>
    %17 = arith.mulf %16, %16 : vector<2x16xf32>
    %cst_9 = arith.constant dense<0.000000e+00> : vector<2xf32>
    %18 = vector.multi_reduction <add>, %17, %cst_9 [1] : vector<2x16xf32> to vector<2xf32>
    %19 = vector.shape_cast %18 : vector<2xf32> to vector<2x1xf32>
    %cst_10 = arith.constant 1.600000e+01 : f32
    %20 = vector.broadcast %cst_10 : f32 to vector<2x1xf32>
    %21 = arith.divf %19, %20 : vector<2x1xf32>
    %cst_11 = arith.constant 9.99999974E-6 : f32
    %22 = vector.broadcast %cst_11 : f32 to vector<2x1xf32>
    %23 = arith.addf %21, %22 : vector<2x1xf32>
    %24 = math.rsqrt %23 : vector<2x1xf32>
    %25 = vector.broadcast %24 : vector<2x1xf32> to vector<2x16xf32>
    %26 = arith.mulf %16, %25 : vector<2x16xf32>
    %c0_12 = arith.constant 0 : index
    %c0_13 = arith.constant 0 : index
    %27 = vector.load %arg4[%c0_12, %c0_13] : memref<1x16xf32, #tpu.memory_space<vmem>>, vector<1x16xf32>
    %28 = vector.broadcast %27 : vector<1x16xf32> to vector<2x16xf32>
    %29 = arith.mulf %26, %28 : vector<2x16xf32>
    %c0_14 = arith.constant 0 : index
    %c0_15 = arith.constant 0 : index
    %30 = vector.load %arg5[%c0_14, %c0_15] : memref<1x16xf32, #tpu.memory_space<vmem>>, vector<1x16xf32>
    %31 = vector.broadcast %30 : vector<1x16xf32> to vector<2x16xf32>
    %32 = arith.addf %29, %31 : vector<2x16xf32>
    %c0_16 = arith.constant 0 : index
    %c0_17 = arith.constant 0 : index
    %33 = vector.load %arg6[%c0_16, %c0_17] : memref<16x128xf32, #tpu.memory_space<vmem>>, vector<16x128xf32>
    %cst_18 = arith.constant dense<0.000000e+00> : vector<2x128xf32>
    %34 = tpu.matmul %32, %33, %cst_18 {dimension_numbers = #tpu.dot_dimension_numbers<[1], [0], [0], [1], [0, 0, 1, 1], [], []>} : vector<2x16xf32>, vector<16x128xf32>, vector<2x128xf32> -> vector<2x128xf32>
    %c0_19 = arith.constant 0 : index
    %c0_20 = arith.constant 0 : index
    %35 = vector.load %arg7[%c0_19, %c0_20] : memref<1x128xf32, #tpu.memory_space<vmem>>, vector<1x128xf32>
    %36 = vector.broadcast %35 : vector<1x128xf32> to vector<2x128xf32>
    %37 = arith.addf %34, %36 : vector<2x128xf32>
    %c0_21 = arith.constant 0 : index
    %c0_22 = arith.constant 0 : index
    %38 = vector.load %arg8[%c0_21, %c0_22] : memref<2x128xf32, #tpu.memory_space<vmem>>, vector<2x128xf32>
    tpu.vector_store %arg8[%c0_21, %c0_22], %37 {strides = array<i32>} : memref<2x128xf32, #tpu.memory_space<vmem>>, vector<2x128xf32>,
    return
  }
  func.func @transform_0(%arg0: i32) -> (i32, i32) {
    %c0_i32 = arith.constant 0 : i32
    %c0_i32_0 = arith.constant 0 : i32
    return %arg0, %c0_i32 : i32, i32
  }
  func.func @transform_1(%arg0: i32) -> (i32, i32) {
    %c0_i32 = arith.constant 0 : i32
    %c0_i32_0 = arith.constant 0 : i32
    %c0_i32_1 = arith.constant 0 : i32
    return %c0_i32, %c0_i32_0 : i32, i32
  }
  func.func @transform_2(%arg0: i32) -> (i32, i32) {
    %c0_i32 = arith.constant 0 : i32
    %c0_i32_0 = arith.constant 0 : i32
    %c0_i32_1 = arith.constant 0 : i32
    return %c0_i32, %c0_i32_0 : i32, i32
  }
  func.func @transform_3(%arg0: i32) -> (i32, i32) {
    %c0_i32 = arith.constant 0 : i32
    %c0_i32_0 = arith.constant 0 : i32
    %c0_i32_1 = arith.constant 0 : i32
    return %c0_i32, %c0_i32_0 : i32, i32
  }
  func.func @transform_4(%arg0: i32) -> (i32, i32) {
    %c0_i32 = arith.constant 0 : i32
    %c0_i32_0 = arith.constant 0 : i32
    %c0_i32_1 = arith.constant 0 : i32
    return %c0_i32, %c0_i32_0 : i32, i32
  }
  func.func @transform_5(%arg0: i32) -> (i32, i32) {
    %c0_i32 = arith.constant 0 : i32
    %c0_i32_0 = arith.constant 0 : i32
    %c0_i32_1 = arith.constant 0 : i32
    return %c0_i32, %c0_i32_0 : i32, i32
  }
  func.func @transform_6(%arg0: i32) -> (i32, i32) {
    %c0_i32 = arith.constant 0 : i32
    %c0_i32_0 = arith.constant 0 : i32
    %c0_i32_1 = arith.constant 0 : i32
    return %c0_i32, %c0_i32_0 : i32, i32
  }
  func.func @transform_7(%arg0: i32) -> (i32, i32) {
    %c0_i32 = arith.constant 0 : i32
    %c0_i32_0 = arith.constant 0 : i32
    return %arg0, %c0_i32 : i32, i32
  }
}

</mosaic_0001>

<bundles_post_ra>
// kernel: critic_layer_forward.1
= control target key start
LH: loop header
LB: loop body
LE: loop exit
PB: predicated region body
PF: predicated region fallthrough
CT: control target
= control target key end

     0   :  { %v280_v0 = vmov 0.0|0.0   ;;  %vm281_vm0 = vmmov 0   ;;  %v282_v4 = vmov 0.0   ;;  %vm38_vm1 = vcmask 261120   ;;  %s359_s1 = inlined_call_operand.vmem [shape: f32[32,16], index: 1, kind: input, shape index: {}]   ;;  %s360_s0 = inlined_call_operand.vmem [shape: f32[2,32], index: 0, kind: input, shape index: {}]   ;;  %s361_s2 = inlined_call_operand.vmem [shape: f32[1,16], index: 2, kind: input, shape index: {}]   ;;  %s362_s5 = inlined_call_operand.vmem [shape: f32[16,128], index: 5, kind: input, shape index: {}]   ;;  %s363_s3 = inlined_call_operand.vmem [shape: f32[1,16], index: 3, kind: input, shape index: {}]   ;;  %s364_s4 = inlined_call_operand.vmem [shape: f32[1,16], index: 4, kind: input, shape index: {}]   ;;  %s365_s6 = inlined_call_operand.vmem [shape: f32[1,128], index: 6, kind: input, shape index: {}]   ;;  %s366_s7 = inlined_call_operand.vmem [shape: f32[2,128], index: 7, kind: output, shape index: {}]  }
   0x1   :  { %266 = vmatprep.subr.bf16.mxu0 %v280_v0  ;;  %v27_v1 = vld [vmem:[%s359_s1] sm:$0xff]  ;;  %v28_v2 = vld [vmem:[%s359_s1 + $0x8] sm:$0xff]  ;;  %v29_v3 = vld [vmem:[%s359_s1 + $0x10] sm:$0xff]  ;;  %256 = vmatprep.mubr.msk.f32.mxu0 %vm281_vm0, %v282_v4  ;;  %vm115_vm3 = vcmask 123904   ;;  %vm155_vm4 = vcmask 130048  }
   0x2   :  { %v267_v5 = vpack.c.bf16 %v28_v2, %v27_v1  ;;  %v30_v6 = vld [vmem:[%s359_s1 + $0x18] sm:$0xff]  ;;  %272 = vmatprep.subr.bf16.mxu1 %v280_v0  ;;  %263 = vmatprep.mubr.msk.f32.mxu1 %vm281_vm0, %v282_v4  ;;  %v26_v8 = vld [vmem:[%s360_s0] sm:$0x3]  ;;  %v147_v22 = vld [vmem:[%s362_s5 + $0x8] sm:$0xff] }
   0x3   :  { %v270_v7 = vpack.c.bf16 %v30_v6, %v29_v3  ;;  %v234_v9 = vld [vmem:[%s361_s2] ss:$0 sm:$0xff] }
   0x4   :  { %268 = vmatpush3.bf16.msra.mxu0 %v267_v5  ;;  %v146_v21 = vld [vmem:[%s362_s5] sm:$0xff] }
   0x5   :  { %269 = vmatprep.subr.bf16.mxu0 %v280_v0  ;;  %v273_v23 = vpack.c.bf16 %v147_v22, %v146_v21  ;;  %v236_v28 = vld [vmem:[%s363_s3] ss:$0 sm:$0xff] }
   0x6   :  { %v237_v30 = vld [vmem:[%s364_s4] ss:$0 sm:$0xff] }
   0x7   :  { %274 = vmatpush3.bf16.msra.mxu1 %v273_v23  ;;  %v238_v33 = vld [vmem:[%s365_s6] ss:$0 sm:$0xff] }
   0x8   :  { %271 = vmatpush3.bf16.msra.mxu0 %v270_v7 }
   0xb   :  { %257 = vmatmul.mubr.msk.f32.vlgmr.msra.gmra.mrb[0].mxu0 %vm38_vm1, %v26_v8 }
  0xde   :  { %v108_v10 = vpop.f32.mrb[0].mxu0 }
  0xdf   :  { %v109_v11 = vadd.f32 %v234_v9, %v108_v10  ;;  %v258_v12 = vpop.f32.mrb[1].mxu0 }
  0xe1   :  { %v113_v13 = vmul.f32 0.1, %v109_v11  ;;  %vm112_vm2 = vcmp.ge.f32.partialorder %v109_v11, 0.0 }
  0xe3   :  { %v114_v14 = vsel %vm112_vm2, %v109_v11, %v113_v13 }
  0xe4   :  { %v116_v15 = vsel %vm115_vm3, %v114_v14, 0.0 }
  0xe5   :  { %117 = vadd.xlane.f32.xlu0 %v116_v15 }
 0x172   :  { %v118_v16 = vpop.xlane.xlu0 %117 }
 0x173   :  { %v120_v17 = vmul.f32 0.0625, %v118_v16 }
 0x175   :  { %v121_v18 = vsub.f32 %v114_v14, %v120_v17 }
 0x177   :  { %v122_v19 = vmul.f32 %v121_v18, %v121_v18 }
 0x179   :  { %v123_v20 = vsel %vm115_vm3, %v122_v19, 0.0 }
 0x17a   :  { %124 = vadd.xlane.f32.xlu0 %v123_v20 }
 0x207   :  { %v125_v24 = vpop.xlane.xlu0 %124 }
 0x208   :  { %v126_v25 = vmul.f32 0.0625, %v125_v24 }
 0x20a   :  { %v127_v26 = vadd.f32 1e-05, %v126_v25 }
 0x20c   :  { %278 = vrsqrt.f32 %v127_v26 }
 0x216   :  { %v279_v27 = vpop.eup %278 }
 0x217   :  { %v129_v29 = vmul.f32 %v279_v27, %v121_v18 }
 0x219   :  { %v137_v31 = vmul.f32 %v236_v28, %v129_v29 }
 0x21b   :  { %v145_v32 = vadd.f32 %v237_v30, %v137_v31 }
 0x21d   :  { %264 = vmatmul.mubr.msk.f32.vlgmr.msra.gmra.mrb[0].mxu1 %vm155_vm4, %v145_v32 }
 0x2f0   :  { %v225_v34 = vpop.f32.mrb[0].mxu1 }
 0x2f1   :  { %v226_v35 = vadd.f32 %v238_v33, %v225_v34  ;;  %v265_v36 = vpop.f32.mrb[1].mxu1 }
 0x2f3   :  { %229 = vst [vmem:[%s366_s7] sm:$0x3] %v226_v35 }

</bundles_post_ra>
